<compile_context>
chip_gen: v6e
topology: v6e:2x2x1
jax: 0.10.0
libtpu: 0.0.40
codegen_flags: <defaults>
</compile_context>

<pallas_src>
import functools

import jax
import jax.numpy as jnp
from jax import lax
from jax.experimental import pallas as pl
from jax.experimental.pallas import tpu as pltpu

DIRECTION_WEIGHT = 0.5   # default direction_weight
VALENCE_WEIGHT = 1.0     # default valence_weight

_LANES = 128
_NUM_SHARDS = 2          # leading "parallel" grid axis: both TCs on v7x,
                         # sequential (and harmless) on single-TC v5e/v6e.


def _round_up(x, m):
    return ((x + m - 1) // m) * m


def _partial_sums_kernel(n_ref, pred_ref, targ_ref, out_ref, *acc_refs,
                         need_mis_v, need_sq_v):
    """One (tile_rows, 128) slab of the interleaved [v, a, v, a, ...] stream.

    Grid = (shard, step): `shard` is the parallel (megacore) axis, `step` the
    sequential reduction axis.  acc_refs are f32 VMEM accumulators
      [0] sum of squared diff (all), [1] sum of sign mismatch (all),
      [2] sum of sign mismatch (valence only)   -- iff need_mis_v,
      [3] sum of squared diff (valence only)    -- iff need_sq_v,
    updated with pure elementwise VPU work every step.  The single cross-lane
    reduction happens only at the last step, writing this shard's partial sums
    into its (8, 128) output slab (sublane 0=sq, 1=mis, 2=mis_v, 3=sq_v).
    """
    shard = pl.program_id(0)
    step = pl.program_id(1)
    steps = pl.num_programs(1)
    tile_rows, lanes = pred_ref.shape

    @pl.when(step == 0)
    def _init():
        for acc in acc_refs:
            acc[...] = jnp.zeros_like(acc)

    pred = pred_ref[...].astype(jnp.float32)   # inputs may be bf16; math is f32
    targ = targ_ref[...].astype(jnp.float32)

    # Unclamped global flat element index.  One mask covers all invalid data:
    #   * zero padding of the flat stream up to a lane multiple,
    #   * the garbage tail of a partial last block,
    #   * duplicated blocks from the clamped index_map of an overhanging shard.
    row_iota = lax.broadcasted_iota(jnp.int32, (tile_rows, lanes), 0)
    lane_iota = lax.broadcasted_iota(jnp.int32, (tile_rows, lanes), 1)
    base = (shard * steps + step) * (tile_rows * lanes)
    valid = (base + row_iota * lanes + lane_iota) < 2 * n_ref[0]

    pred = jnp.where(valid, pred, 0.0)
    targ = jnp.where(valid, targ, 0.0)

    diff = pred - targ
    sq = diff * diff
    mismatch = (pred * targ < 0.0).astype(jnp.float32)   # 0*0 >= 0 -> padding neutral

    acc_refs[0][...] = acc_refs[0][...] + sq
    acc_refs[1][...] = acc_refs[1][...] + mismatch
    if need_mis_v or need_sq_v:
        # Interleaved layout: valence sits at even flat indices; block starts are
        # even (tile_rows*128 is even), so parity is simply the lane parity.
        v_mask = (lane_iota % 2) == 0
    if need_mis_v:
        acc_refs[2][...] = acc_refs[2][...] + jnp.where(v_mask, mismatch, 0.0)
    if need_sq_v:
        acc_refs[3][...] = acc_refs[3][...] + jnp.where(v_mask, sq, 0.0)

    @pl.when(step == steps - 1)
    def _finalize():
        s_sq = jnp.sum(acc_refs[0][...])
        s_mis = jnp.sum(acc_refs[1][...])
        s_mis_v = jnp.sum(acc_refs[2][...]) if need_mis_v else jnp.float32(0.0)
        s_sq_v = jnp.sum(acc_refs[3][...]) if need_sq_v else jnp.float32(0.0)
        r = lax.broadcasted_iota(jnp.int32, (8, _LANES), 0)
        slab = jnp.where(r == 0, s_sq,
               jnp.where(r == 1, s_mis,
               jnp.where(r == 2, s_mis_v, s_sq_v)))
        out_ref[0] = slab


def _emotion_direction_loss_jax(predictions, targets, direction_weight,
                                valence_weight):
    """Pure-JAX path (reference + small-batch bypass), mirrors the PyTorch forward."""
    predictions = predictions.astype(jnp.float32)
    targets = targets.astype(jnp.float32)
    base_loss = jnp.mean((predictions - targets) ** 2)
    pv, pa = predictions[:, 0], predictions[:, 1]
    tv, ta = targets[:, 0], targets[:, 1]
    v_loss = jnp.mean((pv * tv < 0).astype(jnp.float32)) * valence_weight
    a_loss = jnp.mean((pa * ta < 0).astype(jnp.float32))
    direction_loss = (v_loss + a_loss) / (1.0 + valence_weight)
    total = base_loss + direction_weight * direction_loss
    if valence_weight > 1.0:
        v_mse = jnp.mean((pv - tv) ** 2) * valence_weight
        a_mse = jnp.mean((pa - ta) ** 2)
        adjusted = (v_mse + a_mse) / (1.0 + valence_weight)
        total = adjusted + direction_weight * direction_loss
    return total


def emotion_direction_loss(predictions, targets, *,
                           direction_weight=DIRECTION_WEIGHT,
                           valence_weight=VALENCE_WEIGHT,
                           max_tile_rows=2048,
                           min_rows_for_kernel=65536):
    """predictions, targets: (N, 2) float arrays.  Returns scalar float32 loss."""
    predictions = jnp.asarray(predictions)
    targets = jnp.asarray(targets)
    assert predictions.ndim == 2 and predictions.shape[1] == 2, predictions.shape
    assert predictions.shape == targets.shape, (predictions.shape, targets.shape)

    n = predictions.shape[0]

    # Sublane alignment per dtype packing (f32: 8, bf16: 16, int8/fp8: 32).
    def sub_align(dt):
        return 8 * (4 // jnp.dtype(dt).itemsize)
    align = max(sub_align(predictions.dtype), sub_align(targets.dtype))

    rows_needed = pl.cdiv(2 * n, _LANES)
    if n < min_rows_for_kernel or rows_needed < align:
        # Tiny problems (tens of KB): pallas_call fixed cost dominates and XLA
        # fuses this loss into neighboring ops anyway.
        return _emotion_direction_loss_jax(predictions, targets,
                                           direction_weight, valence_weight)

    need_mis_v = (valence_weight != 1.0)   # separate valence mismatch mean
    need_sq_v = (valence_weight > 1.0)     # separate valence MSE (adjusted loss)
    n_acc = 2 + int(need_mis_v) + int(need_sq_v)

    def to_slab(x):
        # Free row-major view: (N, 2) -> (2N,) -> (rows, 128); v/a stay
        # interleaved in lanes, dtype preserved (bf16 halves HBM traffic).
        # Only when 2N is not a lane multiple do we pay a small zero-pad copy;
        # the padding is masked out in-kernel regardless of its value.
        flat = x.reshape(-1)
        total = flat.shape[0]
        padded = _round_up(total, _LANES)
        if padded != total:
            flat = jnp.pad(flat, (0, padded - total))
        return flat.reshape(padded // _LANES, _LANES)

    pred_slab = to_slab(predictions)
    targ_slab = to_slab(targets)
    rows = pred_slab.shape[0]

    tile_rows = min(max_tile_rows, rows)
    tile_rows = max(align, (tile_rows // align) * align)
    total_blocks = pl.cdiv(rows, tile_rows)
    num_shards = min(_NUM_SHARDS, total_blocks)
    steps_per_shard = pl.cdiv(total_blocks, num_shards)

    def in_map(c, i, n_ref):
        # Clamp so the DMA never starts past the array; the duplicated block of
        # an overhanging shard contributes zero via the in-kernel validity mask.
        return (jnp.minimum(c * steps_per_shard + i, total_blocks - 1), 0)

    kernel = functools.partial(_partial_sums_kernel,
                               need_mis_v=need_mis_v, need_sq_v=need_sq_v)

    out = pl.pallas_call(
        kernel,
        out_shape=jax.ShapeDtypeStruct((num_shards, 8, _LANES), jnp.float32),
        grid_spec=pltpu.PrefetchScalarGridSpec(
            num_scalar_prefetch=1,                 # n_valid lives in SMEM
            grid=(num_shards, steps_per_shard),
            in_specs=[
                pl.BlockSpec((tile_rows, _LANES), in_map),
                pl.BlockSpec((tile_rows, _LANES), in_map),
            ],
            out_specs=pl.BlockSpec((1, 8, _LANES), lambda c, i, n_ref: (c, 0, 0)),
            scratch_shapes=[pltpu.VMEM((tile_rows, _LANES), jnp.float32)
                            for _ in range(n_acc)],
        ),
        compiler_params=pltpu.CompilerParams(
            dimension_semantics=("parallel", "arbitrary"),
            vmem_limit_bytes=32 * 1024 * 1024,     # v7x-safe cap
        ),
    )(jnp.array([n], jnp.int32), pred_slab, targ_slab)

    # Combine the per-shard partial sums; the remaining math is a handful of
    # scalar ops that XLA fuses with whatever consumes the loss.
    sums = jnp.sum(out[:, :4, 0], axis=0)
    sum_sq, sum_mis, sum_mis_v, sum_sq_v = sums[0], sums[1], sums[2], sums[3]

    n_f = jnp.float32(n)
    base_loss = sum_sq / (2.0 * n_f)                 # nn.MSELoss mean over N*2 elems
    if valence_weight == 1.0:
        direction_loss = sum_mis / (2.0 * n_f)       # (mean_v + mean_a) / 2
    else:
        v_loss = (sum_mis_v / n_f) * valence_weight
        a_loss = (sum_mis - sum_mis_v) / n_f
        direction_loss = (v_loss + a_loss) / (1.0 + valence_weight)
    total = base_loss + direction_weight * direction_loss
    if valence_weight > 1.0:                         # static branch, mirrors module
        v_mse = (sum_sq_v / n_f) * valence_weight
        a_mse = (sum_sq - sum_sq_v) / n_f
        adjusted = (v_mse + a_mse) / (1.0 + valence_weight)
        total = adjusted + direction_weight * direction_loss
    return total


if __name__ == "__main__":
    key = jax.random.PRNGKey(0)
    kp, kt = jax.random.split(key)

    # N=2500 is not a lane multiple -> exercises flat padding, the partial last
    # block, and the clamped duplicate block of the overhanging shard.
    batch = 2500
    predictions = jax.random.uniform(kp, (batch, 2), jnp.float32, minval=-1.0, maxval=1.0)
    targets = jax.random.uniform(kt, (batch, 2), jnp.float32, minval=-1.0, maxval=1.0)

    # 1) Kernel path, multi-step / multi-shard grid (small tiles force blocks).
    loss = jax.block_until_ready(emotion_direction_loss(
        predictions, targets, max_tile_rows=16, min_rows_for_kernel=0))
    ref = jax.block_until_ready(_emotion_direction_loss_jax(
        predictions, targets, DIRECTION_WEIGHT, VALENCE_WEIGHT))
    assert jnp.allclose(loss, ref, rtol=1e-4, atol=1e-6), (loss, ref)

    # 2) Kernel path, default tiling, 2N a lane multiple (free reshape, no pad).
    p2, t2 = predictions[:2496], targets[:2496]
    loss2 = jax.block_until_ready(emotion_direction_loss(p2, t2, min_rows_for_kernel=0))
    ref2 = jax.block_until_ready(_emotion_direction_loss_jax(
        p2, t2, DIRECTION_WEIGHT, VALENCE_WEIGHT))
    assert jnp.allclose(loss2, ref2, rtol=1e-4, atol=1e-6), (loss2, ref2)

    # 3) valence_weight > 1.0 path (extra accumulators + adjusted loss).
    loss3 = jax.block_until_ready(emotion_direction_loss(
        predictions, targets, valence_weight=2.0, max_tile_rows=16,
        min_rows_for_kernel=0))
    ref3 = jax.block_until_ready(_emotion_direction_loss_jax(
        predictions, targets, DIRECTION_WEIGHT, 2.0))
    assert jnp.allclose(loss3, ref3, rtol=1e-4, atol=1e-6), (loss3, ref3)

    # 4) bf16 inputs stream through the kernel unconverted (bandwidth path).
    pb, tb = p2.astype(jnp.bfloat16), t2.astype(jnp.bfloat16)
    loss4 = jax.block_until_ready(emotion_direction_loss(pb, tb, min_rows_for_kernel=0))
    ref4 = jax.block_until_ready(_emotion_direction_loss_jax(
        pb, tb, DIRECTION_WEIGHT, VALENCE_WEIGHT))
    assert jnp.allclose(loss4, ref4, rtol=1e-4, atol=1e-5), (loss4, ref4)

    # 5) Small-batch bypass (pure-JAX path, default threshold).
    p5, t5 = predictions[:8], targets[:8]
    loss5 = jax.block_until_ready(emotion_direction_loss(p5, t5))
    ref5 = jax.block_until_ready(_emotion_direction_loss_jax(
        p5, t5, DIRECTION_WEIGHT, VALENCE_WEIGHT))
    assert jnp.allclose(loss5, ref5, rtol=1e-5, atol=1e-6), (loss5, ref5)

    print("KERNEL_OK")
</pallas_src>

<mosaic_0001>
module attributes {stable_mosaic.version = 11 : i64} {
  func.func @_partial_sums_kernel(%arg0: i32, %arg1: i32, %arg2: memref<1xi32, #tpu.memory_space<smem>>, %arg3: memref<16x128xf32, #tpu.memory_space<vmem>>, %arg4: memref<16x128xf32, #tpu.memory_space<vmem>>, %arg5: memref<1x8x128xf32, #tpu.memory_space<vmem>>, %arg6: memref<16x128xf32, #tpu.memory_space<vmem>>, %arg7: memref<16x128xf32, #tpu.memory_space<vmem>>) attributes {dimension_semantics = [#tpu.dimension_semantics<parallel>, #tpu.dimension_semantics<arbitrary>], iteration_bounds = array<i64: 2, 2>, scalar_prefetch = 1 : i64, scratch_operands = 2 : i64, tpu.core_type = #tpu.core_type<tc>, window_params = [{transform_indices = @transform_0, window_bounds = array<i64: 16, 128>}, {transform_indices = @transform_1, window_bounds = array<i64: 16, 128>}, {transform_indices = @transform_2, window_bounds = array<i64: 1, 8, 128>}]} {
    %c0_i32 = arith.constant 0 : i32
    %0 = arith.cmpi eq, %arg1, %c0_i32 : i32
    %1 = arith.extui %0 : i1 to i32
    %c0_i32_0 = arith.constant 0 : i32
    %2 = arith.cmpi ne, %1, %c0_i32_0 : i32
    scf.if %2 {
      %cst_17 = arith.constant 0.000000e+00 : f32
      %39 = vector.broadcast %cst_17 : f32 to vector<16x128xf32>
      %c0_18 = arith.constant 0 : index
      %c0_19 = arith.constant 0 : index
      %40 = vector.load %arg6[%c0_18, %c0_19] : memref<16x128xf32, #tpu.memory_space<vmem>>, vector<16x128xf32>
      tpu.vector_store %arg6[%c0_18, %c0_19], %39 {strides = array<i32>} : memref<16x128xf32, #tpu.memory_space<vmem>>, vector<16x128xf32>,
      %cst_20 = arith.constant 0.000000e+00 : f32
      %41 = vector.broadcast %cst_20 : f32 to vector<16x128xf32>
      %c0_21 = arith.constant 0 : index
      %c0_22 = arith.constant 0 : index
      %42 = vector.load %arg7[%c0_21, %c0_22] : memref<16x128xf32, #tpu.memory_space<vmem>>, vector<16x128xf32>
      tpu.vector_store %arg7[%c0_21, %c0_22], %41 {strides = array<i32>} : memref<16x128xf32, #tpu.memory_space<vmem>>, vector<16x128xf32>,
    } else {
    }
    %c0 = arith.constant 0 : index
    %c0_1 = arith.constant 0 : index
    %3 = vector.load %arg3[%c0, %c0_1] : memref<16x128xf32, #tpu.memory_space<vmem>>, vector<16x128xf32>
    %c0_2 = arith.constant 0 : index
    %c0_3 = arith.constant 0 : index
    %4 = vector.load %arg4[%c0_2, %c0_3] : memref<16x128xf32, #tpu.memory_space<vmem>>, vector<16x128xf32>
    %5 = tpu.iota {dimensions = array<i32: 0>} : vector<16x128xi32>
    %6 = tpu.iota {dimensions = array<i32: 1>} : vector<16x128xi32>
    %c2_i32 = arith.constant 2 : i32
    %7 = arith.muli %arg0, %c2_i32 : i32
    %8 = arith.addi %7, %arg1 : i32
    %c2048_i32 = arith.constant 2048 : i32
    %9 = arith.muli %8, %c2048_i32 : i32
    %c128_i32 = arith.constant 128 : i32
    %10 = vector.broadcast %c128_i32 : i32 to vector<16x128xi32>
    %11 = arith.muli %5, %10 : vector<16x128xi32>
    %12 = vector.broadcast %9 : i32 to vector<16x128xi32>
    %13 = arith.addi %12, %11 : vector<16x128xi32>
    %14 = arith.addi %13, %6 : vector<16x128xi32>
    %c0_4 = arith.constant 0 : index
    %15 = memref.load %arg2[%c0_4] : memref<1xi32, #tpu.memory_space<smem>>
    %c2_i32_5 = arith.constant 2 : i32
    %16 = arith.muli %c2_i32_5, %15 : i32
    %17 = vector.broadcast %16 : i32 to vector<16x128xi32>
    %18 = arith.cmpi slt, %14, %17 : vector<16x128xi32>
    %cst = arith.constant 0.000000e+00 : f32
    %19 = vector.broadcast %cst : f32 to vector<16x128xf32>
    %20 = arith.select %18, %3, %19 : vector<16x128xi1>, vector<16x128xf32>
    %cst_6 = arith.constant 0.000000e+00 : f32
    %21 = vector.broadcast %cst_6 : f32 to vector<16x128xf32>
    %22 = arith.select %18, %4, %21 : vector<16x128xi1>, vector<16x128xf32>
    %23 = arith.subf %20, %22 : vector<16x128xf32>
    %24 = arith.mulf %23, %23 : vector<16x128xf32>
    %25 = arith.mulf %20, %22 : vector<16x128xf32>
    %cst_7 = arith.constant 0.000000e+00 : f32
    %26 = vector.broadcast %cst_7 : f32 to vector<16x128xf32>
    %27 = arith.cmpf olt, %25, %26 : vector<16x128xf32>
    %28 = arith.extui %27 : vector<16x128xi1> to vector<16x128xi32>
    %29 = arith.sitofp %28 : vector<16x128xi32> to vector<16x128xf32>
    %c0_8 = arith.constant 0 : index
    %c0_9 = arith.constant 0 : index
    %30 = vector.load %arg6[%c0_8, %c0_9] : memref<16x128xf32, #tpu.memory_space<vmem>>, vector<16x128xf32>
    %31 = arith.addf %30, %24 : vector<16x128xf32>
    %c0_10 = arith.constant 0 : index
    %c0_11 = arith.constant 0 : index
    %32 = vector.load %arg6[%c0_10, %c0_11] : memref<16x128xf32, #tpu.memory_space<vmem>>, vector<16x128xf32>
    tpu.vector_store %arg6[%c0_10, %c0_11], %31 {strides = array<i32>} : memref<16x128xf32, #tpu.memory_space<vmem>>, vector<16x128xf32>,
    %c0_12 = arith.constant 0 : index
    %c0_13 = arith.constant 0 : index
    %33 = vector.load %arg7[%c0_12, %c0_13] : memref<16x128xf32, #tpu.memory_space<vmem>>, vector<16x128xf32>
    %34 = arith.addf %33, %29 : vector<16x128xf32>
    %c0_14 = arith.constant 0 : index
    %c0_15 = arith.constant 0 : index
    %35 = vector.load %arg7[%c0_14, %c0_15] : memref<16x128xf32, #tpu.memory_space<vmem>>, vector<16x128xf32>
    tpu.vector_store %arg7[%c0_14, %c0_15], %34 {strides = array<i32>} : memref<16x128xf32, #tpu.memory_space<vmem>>, vector<16x128xf32>,
    %c1_i32 = arith.constant 1 : i32
    %36 = arith.cmpi eq, %arg1, %c1_i32 : i32
    %37 = arith.extui %36 : i1 to i32
    %c0_i32_16 = arith.constant 0 : i32
    %38 = arith.cmpi ne, %37, %c0_i32_16 : i32
    scf.if %38 {
      %c0_17 = arith.constant 0 : index
      %c0_18 = arith.constant 0 : index
      %39 = vector.load %arg6[%c0_17, %c0_18] : memref<16x128xf32, #tpu.memory_space<vmem>>, vector<16x128xf32>
      %40 = vector.shape_cast %39 : vector<16x128xf32> to vector<1x16x128xf32>
      %cst_19 = arith.constant dense<0.000000e+00> : vector<1xf32>
      %41 = vector.multi_reduction <add>, %40, %cst_19 [1, 2] : vector<1x16x128xf32> to vector<1xf32>
      %42 = vector.shape_cast %41 : vector<1xf32> to vector<1x1x1xf32>
      %43 = vector.extract %42[0, 0, 0] : f32 from vector<1x1x1xf32>
      %c0_20 = arith.constant 0 : index
      %c0_21 = arith.constant 0 : index
      %44 = vector.load %arg7[%c0_20, %c0_21] : memref<16x128xf32, #tpu.memory_space<vmem>>, vector<16x128xf32>
      %45 = vector.shape_cast %44 : vector<16x128xf32> to vector<1x16x128xf32>
      %cst_22 = arith.constant dense<0.000000e+00> : vector<1xf32>
      %46 = vector.multi_reduction <add>, %45, %cst_22 [1, 2] : vector<1x16x128xf32> to vector<1xf32>
      %47 = vector.shape_cast %46 : vector<1xf32> to vector<1x1x1xf32>
      %48 = vector.extract %47[0, 0, 0] : f32 from vector<1x1x1xf32>
      %49 = tpu.iota {dimensions = array<i32: 0>} : vector<8x128xi32>
      %c0_i32_23 = arith.constant 0 : i32
      %50 = vector.broadcast %c0_i32_23 : i32 to vector<8x128xi32>
      %51 = arith.cmpi eq, %49, %50 : vector<8x128xi32>
      %c1_i32_24 = arith.constant 1 : i32
      %52 = vector.broadcast %c1_i32_24 : i32 to vector<8x128xi32>
      %53 = arith.cmpi eq, %49, %52 : vector<8x128xi32>
      %c2_i32_25 = arith.constant 2 : i32
      %54 = vector.broadcast %c2_i32_25 : i32 to vector<8x128xi32>
      %55 = arith.cmpi eq, %49, %54 : vector<8x128xi32>
      %cst_26 = arith.constant 0.000000e+00 : f32
      %cst_27 = arith.constant 0.000000e+00 : f32
      %56 = vector.broadcast %cst_26 : f32 to vector<8x128xf32>
      %57 = vector.broadcast %cst_27 : f32 to vector<8x128xf32>
      %58 = arith.select %55, %56, %57 : vector<8x128xi1>, vector<8x128xf32>
      %59 = vector.broadcast %48 : f32 to vector<8x128xf32>
      %60 = arith.select %53, %59, %58 : vector<8x128xi1>, vector<8x128xf32>
      %61 = vector.broadcast %43 : f32 to vector<8x128xf32>
      %62 = arith.select %51, %61, %60 : vector<8x128xi1>, vector<8x128xf32>
      %c0_28 = arith.constant 0 : index
      %c0_29 = arith.constant 0 : index
      %c0_30 = arith.constant 0 : index
      %63 = vector.load %arg5[%c0_28, %c0_29, %c0_30] : memref<1x8x128xf32, #tpu.memory_space<vmem>>, vector<1x8x128xf32>
      %64 = vector.shape_cast %63 : vector<1x8x128xf32> to vector<8x128xf32>
      %65 = vector.shape_cast %62 : vector<8x128xf32> to vector<1x8x128xf32>
      tpu.vector_store %arg5[%c0_28, %c0_29, %c0_30], %65 {strides = array<i32>} : memref<1x8x128xf32, #tpu.memory_space<vmem>>, vector<1x8x128xf32>,
    } else {
    }
    return
  }
  func.func @transform_0(%arg0: i32, %arg1: i32, %arg2: memref<1xi32, #tpu.memory_space<smem>>) -> (i32, i32) {
    %c2_i32 = arith.constant 2 : i32
    %0 = arith.muli %arg0, %c2_i32 : i32
    %1 = arith.addi %0, %arg1 : i32
    %c2_i32_0 = arith.constant 2 : i32
    %2 = arith.minsi %1, %c2_i32_0 : i32
    %c0_i32 = arith.constant 0 : i32
    %c0_i32_1 = arith.constant 0 : i32
    return %2, %c0_i32 : i32, i32
  }
  func.func @transform_1(%arg0: i32, %arg1: i32, %arg2: memref<1xi32, #tpu.memory_space<smem>>) -> (i32, i32) {
    %c2_i32 = arith.constant 2 : i32
    %0 = arith.muli %arg0, %c2_i32 : i32
    %1 = arith.addi %0, %arg1 : i32
    %c2_i32_0 = arith.constant 2 : i32
    %2 = arith.minsi %1, %c2_i32_0 : i32
    %c0_i32 = arith.constant 0 : i32
    %c0_i32_1 = arith.constant 0 : i32
    return %2, %c0_i32 : i32, i32
  }
  func.func @transform_2(%arg0: i32, %arg1: i32, %arg2: memref<1xi32, #tpu.memory_space<smem>>) -> (i32, i32, i32) {
    %c0_i32 = arith.constant 0 : i32
    %c0_i32_0 = arith.constant 0 : i32
    %c0_i32_1 = arith.constant 0 : i32
    return %arg0, %c0_i32, %c0_i32_0 : i32, i32, i32
  }
}

</mosaic_0001>

<bundles_post_ra>
// kernel: tpu_custom_call.1
= control target key start
LH: loop header
LB: loop body
LE: loop exit
PB: predicated region body
PF: predicated region fallthrough
CT: control target
= control target key end

     0   :  { %s1126_s0 = inlined_call_operand.<no memory space> [shape: s32[1], index: 0, kind: input, shape index: {}]   ;;  %s1127_s1 = inlined_call_operand.hbm [shape: f32[40,128], index: 1, kind: input, shape index: {}]   ;;  %s1128_s2 = inlined_call_operand.hbm [shape: f32[40,128], index: 2, kind: input, shape index: {}]   ;;  %s1129_s3 = inlined_call_operand.hbm [shape: f32[2,8,128], index: 3, kind: output, shape index: {}]  }
   0x1   :  { %1133 = sst [smem:[#allocation18_spill]] %s1127_s1 }
   0x2   :  { %8 = sst [smem:[#allocation5]] %s1126_s0 }
   0x3   :  { %9 = vsyncpa [#allocation7], 0 }
   0x4   :  { %11 = vsyncpa [#allocation7 + $0x1], 0 }
   0x5   :  { %12 = vsyncpa [#allocation10], 0 }
   0x6   :  { %14 = vsyncpa [#allocation10 + $0x1], 0 }
   0x7   :  { %15 = vsyncpa [#allocation8], 0 }
   0x8   :  { %17 = vsyncpa [#allocation8 + $0x1], 0  ;;  %s841_s14 = smov 0   ;;  %s843_s15 = smov 0  }
   0x9   :  { %s845_s16 = smov 0   ;;  %s847_s17 = smov 0  }
   0xa   :  { %s849_s18 = smov 0   ;;  %s851_s19 = smov 0  }
   0xb   :  { %s853_s20 = smov 0   ;;  %s855_s0 = smov 0  }
   0xc   :  { %s857_s21 = smov 0   ;;  %s859_s22 = smov 0  }
   0xd   :  { %s861_s23 = smov 0  }
   0xe LB: > { %1134 = sst [smem:[#allocation15_spill]] %s803_s22  ;;  %s483_s24 = sadd.s32 4294967295, %s807_s23   ;;  %s807_s23 = sphi %s861_s23, %s23_s23   ;;  %s803_s22 = sphi %s859_s22, %s1145_s22   ;;  %s799_s21 = sphi %s857_s21, %s1153_s21   ;;  %s795_s0 = sphi %s855_s0, %s1143_s0   ;;  %s791_s20 = sphi %s853_s20, %s1152_s20   ;;  %s787_s19 = sphi %s851_s19, %s1151_s19   ;;  %s783_s18 = sphi %s849_s18, %s1150_s18   ;;  %s779_s17 = sphi %s847_s17, %s1149_s17   ;;  %s775_s16 = sphi %s845_s16, %s1148_s16   ;;  %s771_s15 = sphi %s843_s15, %s1147_s15   ;;  %s767_s14 = sphi %s841_s14, %s1146_s14  }
   0xf   : > { %s484_s25 = sadd.s32 4294967294, %s807_s23   ;;  %s32_s26 = sadd.s32 1, %s799_s21 }
  0x10   : > { %s35_s27 = sadd.s32 1, %s803_s22  ;;  %p33_p0 = scmp.ge.s32.totalorder %s32_s26, 2 }
  0x11   : > { %s485_s28 = sshll.u32 %s803_s22, 1  ;;  %s50_s30 = sadd.s32 1, %s787_s19 }
  0x12   : > { %s40_s29 = sadd.s32 %s799_s21, %s485_s28  ;;  %s1155_s26 = smov (%p33_p0, %s32_s26), 0 }
  0x13   : > { %1135 = sst [smem:[#allocation16_spill]] %s1155_s26  ;;  %s1157_s27 = smov (!%p33_p0, %s35_s27), %s803_s22 }
  0x14   : > { %p41_p1 = scmp.lt.s32.totalorder %s40_s29, 2  ;;  %p57_p2 = scmp.ne.s32.totalorder %s787_s19, %s783_s18 }
  0x15   : > { %p37_p3 = scmp.ge.s32.totalorder %s1157_s27, 2  ;;  %p58_p4 = scmp.eq.s32.totalorder %s807_s23, 0 }
  0x16   : > { %s1159_s29 = smov (!%p41_p1, %s40_s29), 2  ;;  %p63_p6 = scmp.ne.s32.totalorder %s783_s18, %s779_s17 }
  0x17   : > { %s1161_s27 = smov (%p37_p3, %s1157_s27), 0  ;;  %p913_p5 = por %p58_p4, %p57_p2 }
  0x18   : > { %1136 = sst [smem:[#allocation17_spill]] %s1161_s27  ;;  %s486_s5 = sshll.u32 %s1161_s27, 1 }
  0x19   : > { %p64_p7 = scmp.eq.s32.totalorder %s483_s24, 0  ;;  %s44_s6 = sadd.s32 %s486_s5, %s1155_s26 }
  0x1a   : > { %s107_s7 = ssub.s32 %s803_s22, %s1161_s27  ;;  %p45_p8 = scmp.lt.s32.totalorder %s44_s6, 2 }
  0x1b   : > { %p925_p9 = por %p64_p7, %p63_p6  ;;  %p108_p10 = scmp.eq.s32.totalorder %s107_s7, 0 }
  0x1c   : > { %s110_s9 = sadd.s32 1, %s775_s16  ;;  %s1163_s6 = smov (!%p45_p8, %s44_s6), 2 }
  0x1d   : > { %s931_s10 = scalar_select %p108_p10, %s775_s16, %s110_s9  }
  0x1e   : > { %s47_s11 = ssub.s32 %s1159_s29, %s1163_s6  ;;  %p120_p11 = scmp.ne.s32.totalorder %s775_s16, %s771_s15 }
  0x1f   : > { %p48_p12 = scmp.eq.s32.totalorder %s47_s11, 0  ;;  %p121_p13 = scmp.eq.s32.totalorder %s483_s24, 3 }
  0x20   : > { %p126_p0 = scmp.ne.s32.totalorder %s771_s15, %s767_s14  ;;  %p127_p1 = scmp.eq.s32.totalorder %s484_s25, 3 }
  0x21   : > { %s943_s12 = scalar_select %p48_p12, %s787_s19, %s50_s30  }
  0x22   : > { %p945_p2 = por %p121_p13, %p120_p11  ;;  %p949_p3 = por %p127_p1, %p126_p0 }
  0x23   : > { %p490_p4 = scmp.ge.s32.totalorder %s807_s23, 4 }
  0x24   : > { %s1140_s17 = scalar_select %p949_p3, 1, 0 }
  0x25   : > { %143 = sbr.rel (%p490_p4) target bundleno = 112 (0x70), region = 16 }
  0x2a   : > { %146 = sbr.rel (!%p913_p5) target bundleno = 80 (0x50), region = 20  ;;  %s147_s24 = sand.u32 (%p913_p5), 1, %s787_s19  }
  0x2b   : > { %s493_s25 = sshll.u32 (%p913_p5), %s1159_s29, 1  ;;  %s491_s28 = sshll.u32 (%p913_p5), %s147_s24, 4 }
  0x2c   : > { %s157_s30 = ssub.s32 (%p913_p5), 5, %s493_s25  ;;  %s961_s7 = scalar_lea.sflag (%p913_p5), [#allocation7], %s147_s24 }
  0x2d   : > { %p158_p6 = scmp.lt.s32.totalorder (%p913_p5), %s157_s30, 2  ;;  %s151_s9 = scalar_lea.vmem (%p913_p5), [#allocation6], %s491_s28 }
  0x2f   : > { %s1165_s30 = smov (!%p158_p6, %s157_s30), 2 }
  0x30   : > { %s958_s5 = sshll.u32 %s1165_s30, 7 }
  0x31   : > { %s162_s6 = ssub.s32 256, %s958_s5 }
  0x32   : > { %163 = vsyncadd %s961_s7, %s162_s6  ;;  %p495_p7 = scmp.ne.s32.totalorder %s958_s5, 0  ;;  %s522_s11 = sshll.u32 %s1159_s29, 8 }
  0x33   : > { %s1141_s1 = sld [smem:[#allocation18_spill]]  ;;  %s168_s30 = sshll.u32 %s151_s9, 4  ;;  %s971_s30 = int_to_ptr.vmem [resolvable:$true] %s168_s30 }
  0x39   : > { %s969_s25 = scalar_lea.hbm %s1141_s1, %s522_s11  ;;  %s635_s22 = scalar_lea.hbm %s1141_s1, 640 }
  0x3a   : > { %s631_s24 = scalar_lea.hbm %s969_s25, %s958_s5 }
  0x3b   : > { %p632_p8 = scmp.ne.s32.totalorder %s969_s25, %s631_s24  ;;  %p637_p12 = scmp.lt.s32.totalorder %s635_s22, %s631_s24 }
  0x3d   : > { %p633_p10 = pnand %p632_p8, %p495_p7 }
  0x3f   : > { %p634_p11 = pneg %p633_p10 }
  0x41   : > { %p639_p13 = pnand %p637_p12, %p634_p11 }
  0x43   : > { %642 = shalt.err (!%p639_p13)
}
  0x44   : > { %s643_s26 = scalar_lea.vmem %s971_s30, %s958_s5  ;;  %s809_s27 = smov [#allocation6]  }
  0x45   : > { %p644_p0 = scmp.ne.s32.totalorder %s971_s30, %s643_s26  ;;  %s647_s9 = sshll.u32 %s809_s27, 4  ;;  %s648_s9 = int_to_ptr.vmem [resolvable:$false] %s647_s9 }
  0x46   : > { %s649_s11 = scalar_lea.vmem %s648_s9, 512  ;;  %p650_p6 = scmp.lt.s32.totalorder %s971_s30, %s648_s9 }
  0x47   : > { %p645_p1 = pnand %p644_p0, %p495_p7  ;;  %p651_p8 = scmp.lt.s32.totalorder %s649_s11, %s643_s26 }
  0x49   : > { %p646_p4 = pneg %p645_p1  ;;  %p652_p10 = por %p651_p8, %p650_p6 }
  0x4b   : > { %p653_p3 = pnand %p652_p10, %p646_p4 }
  0x4d   : > { %656 = shalt.err (!%p653_p3)
}
  0x4e   : > { %s810_s22 = smov 128   ;;  %s811_s24 = smov 8  }
  0x4f   : > { %174 = dma.hbm_to_vmem [thread:$0]  (%p495_p7), %s969_s25, %s958_s5, %s971_s30, %s961_s7, %s810_s22, %s810_s22, %s811_s24  }
  0x50 PF: > { %177 = sbr.rel (!%p913_p5) target bundleno = 112 (0x70), region = 24  ;;  %s178_s28 = sand.u32 (%p913_p5), 1, %s787_s19  }
  0x51   : > { %s501_s6 = sshll.u32 (%p913_p5), %s1159_s29, 1  ;;  %s499_s26 = sshll.u32 (%p913_p5), %s178_s28, 4 }
  0x52   : > { %s188_s27 = ssub.s32 (%p913_p5), 5, %s501_s6  ;;  %s1000_s1 = scalar_lea.sflag (%p913_p5), [#allocation10], %s178_s28 }
  0x53   : > { %p189_p3 = scmp.lt.s32.totalorder (%p913_p5), %s188_s27, 2  ;;  %s182_s5 = scalar_lea.vmem (%p913_p5), [#allocation9], %s499_s26 }
  0x55   : > { %s1167_s27 = smov (!%p189_p3, %s188_s27), 2 }
  0x56   : > { %s997_s9 = sshll.u32 %s1167_s27, 7 }
  0x57   : > { %s193_s11 = ssub.s32 256, %s997_s9 }
  0x58   : > { %194 = vsyncadd %s1000_s1, %s193_s11  ;;  %p503_p5 = scmp.ne.s32.totalorder %s997_s9, 0  ;;  %s523_s4 = sshll.u32 %s1159_s29, 8 }
  0x59   : > { %s1008_s30 = scalar_lea.hbm %s1128_s2, %s523_s4  ;;  %s199_s22 = sshll.u32 %s182_s5, 4  ;;  %s1010_s22 = int_to_ptr.vmem [resolvable:$true] %s199_s22 }
  0x5a   : > { %s657_s24 = scalar_lea.hbm %s1008_s30, %s997_s9  ;;  %s661_s26 = scalar_lea.hbm %s1128_s2, 640 }
  0x5b   : > { %p658_p7 = scmp.ne.s32.totalorder %s1008_s30, %s657_s24  ;;  %p663_p13 = scmp.lt.s32.totalorder %s661_s26, %s657_s24 }
  0x5d   : > { %p659_p11 = pnand %p658_p7, %p503_p5 }
  0x5f   : > { %p660_p12 = pneg %p659_p11 }
  0x61   : > { %p665_p0 = pnand %p663_p13, %p660_p12 }
  0x63   : > { %668 = shalt.err (!%p665_p0)
}
  0x64   : > { %s669_s29 = scalar_lea.vmem %s1010_s22, %s997_s9  ;;  %s812_s27 = smov [#allocation9]  }
  0x65   : > { %p670_p1 = scmp.ne.s32.totalorder %s1010_s22, %s669_s29  ;;  %s673_s11 = sshll.u32 %s812_s27, 4  ;;  %s674_s11 = int_to_ptr.vmem [resolvable:$false] %s673_s11 }
  0x66   : > { %s675_s5 = scalar_lea.vmem %s674_s11, 512  ;;  %p676_p8 = scmp.lt.s32.totalorder %s1010_s22, %s674_s11 }
  0x67   : > { %p671_p4 = pnand %p670_p1, %p503_p5  ;;  %p677_p10 = scmp.lt.s32.totalorder %s675_s5, %s669_s29 }
  0x69   : > { %p672_p6 = pneg %p671_p4  ;;  %p678_p3 = por %p677_p10, %p676_p8 }
  0x6b   : > { %p679_p7 = pnand %p678_p3, %p672_p6 }
  0x6d   : > { %682 = shalt.err (!%p679_p7)
}
  0x6e   : > { %s813_s4 = smov 128   ;;  %s814_s7 = smov 8  }
  0x6f   : > { %205 = dma.hbm_to_vmem [thread:$0]  (%p503_p5), %s1008_s30, %s997_s9, %s1010_s22, %s1000_s1, %s813_s4, %s813_s4, %s814_s7  }
  0x70 PF: > { %p507_p11 = scmp.ge.s32.totalorder %s807_s23, 1  ;;  %p207_p12 = scmp.lt.s32.totalorder %s807_s23, 5 }
  0x72   : > { %p208_p13 = pnand %p507_p11, %p207_p12 }
  0x73   : > { %s213_s25 = sand.u32 (!%p208_p13), 1, %s783_s18  }
  0x74   : > { %211 = sbr.rel (%p208_p13) target bundleno = 395 (0x18b), region = 28  ;;  %s508_s24 = sshll.u32 (!%p208_p13), %s213_s25, 4 }
  0x75   : > { %s214_s28 = scalar_lea.sflag (!%p208_p13), [#allocation7], %s213_s25  ;;  %s1035_s6 = scalar_lea.vmem (!%p208_p13), [#allocation6], %s508_s24 }
  0x79   : > { %754 = dma.done.wait (%p925_p9), %s214_s28, 256  }
  0x7a   : > { %756 = vsyncadd (%p925_p9), %s214_s28, 4294967040  ;;  %s223_s1 = scalar_lea.sflag [#allocation10], %s213_s25  ;;  %s1041_s9 = scalar_lea.vmem [#allocation9], %s508_s24 }
  0x7b   : > { %758 = dma.done.wait (%p925_p9), %s223_s1, 256  }
  0x7c   : > { %760 = vsyncadd (%p925_p9), %s223_s1, 4294967040  ;;  %s249_s30 = sand.u32 1, %s771_s15   ;;  %p511_p5 = scmp.ne.s32.totalorder %s791_s20, 0 }
  0x7d   : > { %s1050_s22 = sshll.u32 %s249_s30, 3 }
  0x7e   : > { %s251_s26 = scalar_lea.vmem [#allocation11], %s1050_s22  ;;  %273 = sbr.rel (%p511_p5) target bundleno = 134 (0x86), region = 40 }
  0x83   : > { %v815_v0 = vmov 0.0  }
  0x84   : > { %274 = vst [vmem:[#allocation2] sm:$0xff] %v815_v0  ;;  %275 = vst [vmem:[#allocation2 + $0x8] sm:$0xff] %v815_v0 }
  0x85   : > { %276 = vst [vmem:[#allocation3 + $0x8] sm:$0xff] %v815_v0  ;;  %277 = vst [vmem:[#allocation3] sm:$0xff] %v815_v0 }
  0x86 PF: > { %v282_v1 = vlaneseq  ;;  %s512_s8 = sshll.u32 %s795_s0, 1  ;;  %s297_s29 = sld [smem:[#allocation5]]  ;;  %v278_v10 = vld [vmem:[%s1035_s6] sm:$0xff]  ;;  %v279_v14 = vld [vmem:[%s1035_s6 + $0x8] sm:$0xff]  ;;  %v816_v29 = vmov 0.0  }
  0x87   : > { %s288_s27 = sadd.s32 %s791_s20, %s512_s8  ;;  %v280_v11 = vld [vmem:[%s1041_s9] sm:$0xff]  ;;  %v281_v15 = vld [vmem:[%s1041_s9 + $0x8] sm:$0xff]  ;;  %p517_p9 = scmp.ne.s32.totalorder %s791_s20, 1 }
  0x88   : > { %v1056_v2 = vshrl.u32 %v282_v1, 7  ;;  %s513_s11 = sshll.u32 %s288_s27, 11  ;;  %v286_v4 = vand.u32 127, %v282_v1 }
  0x89   : > { %v292_v3 = vstv %s513_s11 }
  0x8a   : > { %v290_v5 = vmul.u32 128, %v1056_v2  ;;  %v284_v6 = vadd.s32 8, %v1056_v2 }
  0x8b   : > { %v318_v21 = vld [vmem:[#allocation2] sm:$0xff]  ;;  %v319_v28 = vld [vmem:[#allocation2 + $0x8] sm:$0xff] }
  0x8c   : > { %v293_v7 = vadd.s32 %v292_v3, %v290_v5  ;;  %s514_s5 = sshll.u32 %s297_s29, 1  ;;  %v291_v8 = vmul.u32 128, %v284_v6  ;;  %v324_v24 = vld [vmem:[#allocation3 + $0x8] sm:$0xff]  ;;  %v325_v31 = vld [vmem:[#allocation3] sm:$0xff] }
  0x8d   : > { %v299_v9 = vstv %s514_s5 }
  0x8e   : > { %v295_v12 = vadd.s32 %v293_v7, %v286_v4  ;;  %v294_v13 = vadd.s32 %v292_v3, %v291_v8 }
  0x90   : > { %vm300_vm0 = vcmp.lt.s32.totalorder %v295_v12, %v299_v9  ;;  %v296_v16 = vadd.s32 %v294_v13, %v286_v4 }
  0x91   : > { %v302_v17 = vsel %vm300_vm0, %v278_v10, 0.0  ;;  %v304_v18 = vsel %vm300_vm0, %v280_v11, 0.0 }
  0x92   : > { %v306_v19 = vsub.f32 %v302_v17, %v304_v18  ;;  %vm301_vm1 = vcmp.lt.s32.totalorder %v296_v16, %v299_v9  ;;  %v310_v20 = vmul.f32 %v304_v18, %v302_v17 }
  0x93   : > { %v303_v22 = vsel %vm301_vm1, %v279_v14, 0.0  ;;  %v305_v23 = vsel %vm301_vm1, %v281_v15, 0.0 }
  0x94   : > { %v308_v25 = vmul.f32 %v306_v19, %v306_v19  ;;  %v307_v26 = vsub.f32 %v303_v22, %v305_v23  ;;  %vm312_vm2 = vcmp.lt.f32.partialorder %v310_v20, 0.0  ;;  %v311_v27 = vmul.f32 %v305_v23, %v303_v22 }
  0x95   : > { %v515_v30 = vsel %vm312_vm2, 1.0, %v816_v29 }
  0x96   : > { %v320_v32 = vadd.f32 %v318_v21, %v308_v25  ;;  %v309_v33 = vmul.f32 %v307_v26, %v307_v26  ;;  %v326_v34 = vadd.f32 %v515_v30, %v324_v24  ;;  %vm313_vm3 = vcmp.lt.f32.partialorder %v311_v27, 0.0  ;;  %333 = sbr.rel (%p517_p9) target bundleno = 372 (0x174), region = 44 }
  0x97   : > { %v516_v35 = vsel %vm313_vm3, 1.0, %v816_v29 }
  0x98   : > { %322 = vst [vmem:[#allocation2] sm:$0xff] %v320_v32  ;;  %v321_v36 = vadd.f32 %v319_v28, %v309_v33  ;;  %328 = vst [vmem:[#allocation3 + $0x8] sm:$0xff] %v326_v34  ;;  %v327_v37 = vadd.f32 %v516_v35, %v325_v31 }
  0x9a   : > { %323 = vst [vmem:[#allocation2 + $0x8] sm:$0xff] %v321_v36  ;;  %329 = vst [vmem:[#allocation3] sm:$0xff] %v327_v37 }
  0x9b   : > { %vm359_vm4 = vcmp.eq.s32.totalorder %v1056_v2, 1  ;;  %vm358_vm5 = vcmp.eq.s32.totalorder %v1056_v2, 0 }
  0x9f   : > { %v334_v38 = vld [vmem:[#allocation2] sm:$0xff]  ;;  %v346_v40 = vld [vmem:[#allocation3 + $0x8] sm:$0xff] }
  0xa1   : > { %v335_v39 = vld [vmem:[#allocation2 + $0x8] sm:$0xff]  ;;  %v347_v42 = vld [vmem:[#allocation3] sm:$0xff] }
  0xa2   : > { %v336_v41 = vadd.f32 %v335_v39, %v334_v38  ;;  %v348_v43 = vadd.f32 %v347_v42, %v346_v40 }
  0xa4   : > { %337 = vadd.xlane.f32.xlu0 %v336_v41 }
  0xa8   : > { %349 = vadd.xlane.f32.xlu0 %v348_v43 }
 0x12d   : > { %v338_v44 = vpop.xlane.xlu0 %337 }
 0x12e   : > { %v339_v45 = vrot.slane %v338_v44, 4 }
 0x130   : > { %v340_v46 = vadd.f32 %v339_v45, %v338_v44 }
 0x131   : > { %v350_v47 = vpop.xlane.xlu0 %349 }
 0x132   : > { %v341_v48 = vrot.slane %v340_v46, 2  ;;  %v351_v49 = vrot.slane %v350_v47, 4 }
 0x134   : > { %v352_v50 = vadd.f32 %v351_v49, %v350_v47  ;;  %v342_v51 = vadd.f32 %v341_v48, %v340_v46 }
 0x136   : > { %v353_v52 = vrot.slane %v352_v50, 2  ;;  %v343_v53 = vrot.slane %v342_v51, 1 }
 0x138   : > { %v354_v54 = vadd.f32 %v353_v52, %v352_v50  ;;  %v344_v55 = vadd.f32 %v343_v53, %v342_v51 }
 0x13a   : > { %524 = vpush %v344_v55  ;;  %v355_v56 = vrot.slane %v354_v54, 1 }
 0x13c   : > { %v356_v57 = vadd.f32 %v355_v56, %v354_v54 }
 0x13e   : > { %526 = vpush %v356_v57 }
 0x16b   : > { %s525_s20 = spop %524 }
 0x16c   : > { %v362_v59 = vstv %s525_s20 }
 0x16f   : > { %s527_s4 = spop %526 }
 0x170   : > { %v360_v58 = vstv %s527_s4 }
 0x171   : > { %v361_v60 = vsel %vm359_vm4, %v360_v58, 0.0 }
 0x172   : > { %v363_v61 = vsel %vm358_vm5, %v362_v59, %v361_v60 }
 0x173   : > { %364 = vst [vmem:[%s251_s26] sm:$0xff] %v363_v61 }
 0x174 PF: > { %s519_s7 = sshll.u32 %s795_s0, 7  ;;  %s379_s6 = sshll.u32 %s251_s26, 4  ;;  %s380_s6 = int_to_ptr.vmem [resolvable:$true] %s379_s6 }
 0x175   : > { %s377_s28 = scalar_lea.hbm %s1129_s3, %s519_s7  ;;  %s366_s1 = scalar_lea.sflag [#allocation8], %s249_s30 }
 0x176   : > { %s683_s9 = scalar_lea.vmem %s380_s6, 128  ;;  %s817_s8 = smov [#allocation11]  }
 0x177   : > { %p684_p0 = scmp.ne.s32.totalorder %s380_s6, %s683_s9  ;;  %s687_s29 = sshll.u32 %s817_s8, 4  ;;  %s688_s29 = int_to_ptr.vmem [resolvable:$false] %s687_s29 }
 0x178   : > { %s689_s27 = scalar_lea.vmem %s688_s29, 256  ;;  %p690_p6 = scmp.lt.s32.totalorder %s380_s6, %s688_s29 }
 0x179   : > { %p685_p1 = pnand %p684_p0, %p945_p2  ;;  %p691_p8 = scmp.lt.s32.totalorder %s689_s27, %s683_s9 }
 0x17b   : > { %p686_p4 = pneg %p685_p1  ;;  %p692_p10 = por %p691_p8, %p690_p6 }
 0x17d   : > { %p693_p3 = pnand %p692_p10, %p686_p4 }
 0x17f   : > { %696 = shalt.err (!%p693_p3)
}
 0x180   : > { %s697_s0 = scalar_lea.hbm %s377_s28, 128  ;;  %s701_s26 = scalar_lea.hbm %s1129_s3, 256 }
 0x181   : > { %p698_p7 = scmp.ne.s32.totalorder %s377_s28, %s697_s0  ;;  %p702_p13 = scmp.lt.s32.totalorder %s377_s28, %s1129_s3 }
 0x182   : > { %p703_p5 = scmp.lt.s32.totalorder %s701_s26, %s697_s0 }
 0x183   : > { %p699_p11 = pnand %p698_p7, %p945_p2 }
 0x184   : > { %p704_p9 = por %p703_p5, %p702_p13 }
 0x185   : > { %p700_p12 = pneg %p699_p11 }
 0x187   : > { %p705_p0 = pnand %p704_p9, %p700_p12 }
 0x189   : > { %708 = shalt.err (!%p705_p0)
}
 0x18a   : > { %530 = dma.vmem_to_hbm [thread:$0]  (%p945_p2), %s380_s6, 128, %s377_s28, %s366_s1  }
 0x18b PF: > { %p536_p1 = scmp.ge.s32.totalorder %s807_s23, 2  ;;  %s391_s20 = sand.u32 1, %s767_s14  }
 0x18c   : > { %p1142_p4 = scmp.ne.s32.totalorder %s1140_s17, 0  ;;  %s392_s4 = scalar_lea.sflag [#allocation8], %s391_s20 }
 0x18e   : > { %p533_p6 = pnand %p536_p1, %p1142_p4 }
 0x190   : > { %p534_p8 = pneg %p533_p6 }
 0x192   : > { %762 = dma.done.wait (%p534_p8), %s392_s4, 128  }
 0x193   : > { %764 = vsyncadd (%p534_p8), %s392_s4, 4294967168  ;;  %s23_s23 = sadd.s32 1, %s807_s23   ;;  %s1143_s0 = sld [smem:[#allocation15_spill]] }
 0x194   : > { %p20_p10 = scmp.ge.s32.totalorder %s23_s23, 6   ;;  %s1144_s13 = sld [smem:[#allocation16_spill]] }
 0x195   : > { %s1145_s22 = sld [smem:[#allocation17_spill]]  ;;  %s1146_s14 = smov %s771_s15 }
 0x196   : > { %s1147_s15 = smov %s775_s16  ;;  %s1148_s16 = smov %s931_s10 }
 0x197   : > { %s1149_s17 = smov %s783_s18  ;;  %s1150_s18 = smov %s787_s19 }
 0x198   : > { %s1151_s19 = smov %s943_s12  ;;  %s1152_s20 = smov %s799_s21 }
 0x199   :  { %22 = sbr.rel (!%p20_p10) target bundleno = 14 (0xe), region = 94 }
 0x19a   : > { %s1153_s21 = smov %s1144_s13 }
 0x19e   :  { %397 = vsyncpa [#allocation7], 1 }
 0x19f   :  { %399 = vsyncpa [#allocation7 + $0x1], 1 }
 0x1a0   :  { %400 = vsyncpa [#allocation10], 1 }
 0x1a1   :  { %402 = vsyncpa [#allocation10 + $0x1], 1 }
 0x1a2   :  { %403 = vsyncpa [#allocation8], 1 }
 0x1a3   :  { %405 = vsyncpa [#allocation8 + $0x1], 1 }

</bundles_post_ra>
